<compile_context>
chip_gen: v6e
topology: v6e:2x2x1
jax: 0.10.0
libtpu: 0.0.40
codegen_flags: <defaults>
</compile_context>

<pallas_src>
import jax
import jax.numpy as jnp
from jax.experimental import pallas as pl
from jax.experimental.pallas import tpu as pltpu


# ------------------------------ Pallas kernel -------------------------------

def identity_copy_kernel(x_ref, o_ref):
    # Pure copy: VMEM tile in -> VMEM tile out (Pallas pipelines the HBM DMAs).
    o_ref[...] = x_ref[...]


# ------------------------------ JAX wrapper ---------------------------------

_LANE = 128      # last dim maps onto the 128 vector lanes -> lane-dense stores
_TM_MAX = 2048   # rows per grid step for large inputs (2048*128*4B = 1 MiB block)


@jax.jit
def identity(x):
    """Identity forward pass routed through a lane-dense Pallas copy kernel."""
    orig_shape = x.shape
    n = x.size

    # Lay the data out as (rows, 128): lane-dense, sublane-friendly.
    rows = pl.cdiv(n, _LANE)
    tm = rows if rows <= _TM_MAX else _TM_MAX      # single grid step when small
    grid_rows = pl.cdiv(rows, tm)
    padded_rows = grid_rows * tm
    padded_n = padded_rows * _LANE

    flat = x.reshape(-1)
    if padded_n != n:
        flat = jnp.pad(flat, (0, padded_n - n))
    x2 = flat.reshape(padded_rows, _LANE)

    out2 = pl.pallas_call(
        identity_copy_kernel,
        out_shape=jax.ShapeDtypeStruct((padded_rows, _LANE), x2.dtype),
        grid_spec=pltpu.PrefetchScalarGridSpec(
            num_scalar_prefetch=0,
            grid=(grid_rows,),
            in_specs=[pl.BlockSpec((tm, _LANE), lambda i: (i, 0))],
            out_specs=pl.BlockSpec((tm, _LANE), lambda i: (i, 0)),
        ),
        compiler_params=pltpu.CompilerParams(
            dimension_semantics=("parallel",)),
    )(x2)

    out = out2.reshape(-1)
    if padded_n != n:
        out = out[:n]
    return out.reshape(orig_shape)


# ----------------------------------- main -----------------------------------

if __name__ == "__main__":
    key = jax.random.PRNGKey(0)
    x = jax.random.normal(key, (2, 4, 16, 16), dtype=jnp.float32)

    out = jax.block_until_ready(identity(x))

    assert out.shape == x.shape, out.shape
    assert out.dtype == x.dtype, out.dtype
    assert jnp.array_equal(out, x), float(jnp.max(jnp.abs(out - x)))

    print("KERNEL_OK")
</pallas_src>

<mosaic_0001>
module attributes {stable_mosaic.version = 11 : i64} {
  func.func @identity_copy_kernel(%arg0: i32, %arg1: memref<16x128xf32, #tpu.memory_space<vmem>>, %arg2: memref<16x128xf32, #tpu.memory_space<vmem>>) attributes {dimension_semantics = [#tpu.dimension_semantics<parallel>], iteration_bounds = array<i64: 1>, scalar_prefetch = 0 : i64, scratch_operands = 0 : i64, tpu.core_type = #tpu.core_type<tc>, window_params = [{transform_indices = @transform_0, window_bounds = array<i64: 16, 128>}, {transform_indices = @transform_1, window_bounds = array<i64: 16, 128>}]} {
    %c0 = arith.constant 0 : index
    %c0_0 = arith.constant 0 : index
    %0 = vector.load %arg1[%c0, %c0_0] : memref<16x128xf32, #tpu.memory_space<vmem>>, vector<16x128xf32>
    %c0_1 = arith.constant 0 : index
    %c0_2 = arith.constant 0 : index
    %1 = vector.load %arg2[%c0_1, %c0_2] : memref<16x128xf32, #tpu.memory_space<vmem>>, vector<16x128xf32>
    tpu.vector_store %arg2[%c0_1, %c0_2], %0 {strides = array<i32>} : memref<16x128xf32, #tpu.memory_space<vmem>>, vector<16x128xf32>,
    return
  }
  func.func @transform_0(%arg0: i32) -> (i32, i32) {
    %c0_i32 = arith.constant 0 : i32
    %c0_i32_0 = arith.constant 0 : i32
    return %arg0, %c0_i32 : i32, i32
  }
  func.func @transform_1(%arg0: i32) -> (i32, i32) {
    %c0_i32 = arith.constant 0 : i32
    %c0_i32_0 = arith.constant 0 : i32
    return %arg0, %c0_i32 : i32, i32
  }
}

</mosaic_0001>

<bundles_post_ra>
// kernel: identity.1
= control target key start
LH: loop header
LB: loop body
LE: loop exit
PB: predicated region body
PF: predicated region fallthrough
CT: control target
= control target key end

     0   :  { %s38_s0 = inlined_call_operand.vmem [shape: f32[16,128], index: 0, kind: input, shape index: {}]   ;;  %s39_s1 = inlined_call_operand.vmem [shape: f32[16,128], index: 1, kind: output, shape index: {}]  }
   0x1   :  { %v8_v0 = vld [vmem:[%s38_s0] sm:$0xff]  ;;  %v9_v1 = vld [vmem:[%s38_s0 + $0x8] sm:$0xff] }
   0x2   :  { %10 = vst [vmem:[%s39_s1] sm:$0xff] %v8_v0  ;;  %11 = vst [vmem:[%s39_s1 + $0x8] sm:$0xff] %v9_v1 }

</bundles_post_ra>
